<compile_context>
chip_gen: v6e
topology: v6e:2x2x1
jax: 0.10.0
libtpu: 0.0.40
codegen_flags: <defaults>
</compile_context>

<pallas_src>
import functools

import jax
import jax.numpy as jnp
from jax.experimental import pallas as pl
from jax.experimental.pallas import tpu as pltpu

ALPHA = 1.0
GAMMA = 2  # statically 2 -> explicit square in the kernel


def _focal_loss_kernel(logits_ref, targets_ref, out_ref, *,
                       n_total, ragged, compute_dtype, resident_targets):
    i = pl.program_id(0)

    x = logits_ref[...].astype(compute_dtype)            # (TILE_N, C)
    tile_n, c = x.shape

    if resident_targets:
        start = i * tile_n
        if tile_n % 8 == 0:
            start = pl.multiple_of(start, 8)
        t = targets_ref[pl.ds(start, tile_n), :]          # (TILE_N, 1) int32
    else:
        t = targets_ref[...]                              # (TILE_N, 1) int32

    # Row-wise numerically-stable softmax stats in the "max-shifted" frame
    # (the max cancels in ce = lse - shifted[target]).
    m = jnp.max(x, axis=-1, keepdims=True)                # (TILE_N, 1)
    shifted = x - m                                       # compute dtype
    sum_exp = jnp.sum(jnp.exp(shifted).astype(jnp.float32),
                      axis=-1, keepdims=True)             # f32 (TILE_N, 1)
    lse = jnp.log(sum_exp)

    # Gather shifted[row, target[row]] with a masked reduce (no full one-hot
    # log-softmax materialized). Precondition: 0 <= target < C (PyTorch's
    # cross_entropy would raise for out-of-range / ignore_index targets).
    cls_idx = jax.lax.broadcasted_iota(jnp.int32, (tile_n, c), 1)
    tgt_shifted = jnp.sum(
        jnp.where(cls_idx == t, shifted, 0.0).astype(jnp.float32),
        axis=-1, keepdims=True)                           # f32 (TILE_N, 1)

    ce = lse - tgt_shifted                                # per-sample CE, f32
    pt = jnp.exp(-ce)
    d = 1.0 - pt
    focal = ALPHA * d * d * ce                            # gamma == 2 -> square

    if ragged:
        # Only the last tile can be ragged; zero padded rows' contributions.
        # (Row-wise garbage from the unmasked padded logits rows is confined
        # to those rows, so masking the per-row focal value is sufficient.)
        row_ids = i * tile_n + jax.lax.broadcasted_iota(
            jnp.int32, (tile_n, 1), 0)
        focal = jnp.where(row_ids < n_total, focal, 0.0)

    out_ref[...] = jnp.sum(focal).reshape(1, 1)           # per-tile partial


def _vmem_limit_bytes():
    try:
        cap = pltpu.get_tpu_info().vmem_capacity_bytes
    except Exception:
        cap = 64 * 1024 * 1024        # assume the smallest (v7x per-TC) VMEM
    # ~3/4 of physical, capped at 96 MiB: 96 MiB on v5e/v6e, 48 MiB on v7x.
    return int(max(32 * 1024 * 1024, min((cap * 3) // 4, 96 * 1024 * 1024)))


def _choose_tile_n(n, c, in_itemsize, compute_itemsize, vmem_limit):
    # Sublane alignment for the input dtype: 8 rows (f32) / 16 (bf16) / 32 (i8).
    align = max(8, 32 // max(1, in_itemsize))
    # Real per-row VMEM footprint of one grid step:
    #   2x double-buffered logits tile (input dtype)
    # + ~3 whole-tile temporaries in the compute dtype (shifted, exp, select)
    # + ~2 whole-tile f32 casts feeding the class-axis reductions
    # + 1 int32 class iota.
    per_row = c * (2 * in_itemsize + 3 * compute_itemsize + 3 * 4)
    budget = (vmem_limit * 3) // 5        # slack for Mosaic internal scratch
    rows = max(align, budget // max(per_row, 1))
    if rows >= n:
        return n                          # single tile covers the whole batch
    return max(align, (rows // align) * align)


def focal_loss(inputs, targets, *, tile_n=None, compute_dtype=None,
               resident_targets=None):
    """Mean focal loss (alpha=1, gamma=2) over (N, C) logits and (N,) labels."""
    n, c = inputs.shape

    if compute_dtype is None:
        # bf16 element-wise pipeline for bf16 inputs (v6e/v7x); on v5e pass
        # compute_dtype=jnp.float32 explicitly (no bf16 VPU/EUP there).
        compute_dtype = (jnp.bfloat16 if inputs.dtype == jnp.bfloat16
                         else jnp.float32)
    compute_dtype = jnp.dtype(compute_dtype)

    vmem_limit = _vmem_limit_bytes()
    if tile_n is None:
        tile_n = _choose_tile_n(n, c, inputs.dtype.itemsize,
                                compute_dtype.itemsize, vmem_limit)
    num_tiles = pl.cdiv(n, tile_n)
    padded_n = num_tiles * tile_n

    if resident_targets is None:
        # A resident (padded_n, 1) int32 block costs ~512 B of VMEM per 8 rows
        # (lane padding); keep it resident only while that stays small.
        resident_targets = padded_n <= 8192

    targets2d = targets.astype(jnp.int32).reshape(n, 1)
    if padded_n != n:
        targets2d = jnp.pad(targets2d, ((0, padded_n - n), (0, 0)))

    if resident_targets:
        tgt_spec = pl.BlockSpec((padded_n, 1), lambda i: (0, 0))   # resident
    else:
        tgt_spec = pl.BlockSpec((tile_n, 1), lambda i: (i, 0))     # per-step

    kernel = functools.partial(
        _focal_loss_kernel,
        n_total=n,
        ragged=(padded_n != n),
        compute_dtype=compute_dtype,
        resident_targets=resident_targets)

    partials = pl.pallas_call(
        kernel,
        out_shape=jax.ShapeDtypeStruct((1, num_tiles), jnp.float32),
        grid_spec=pltpu.PrefetchScalarGridSpec(
            num_scalar_prefetch=0,
            grid=(num_tiles,),
            in_specs=[
                pl.BlockSpec((tile_n, c), lambda i: (i, 0)),   # logits tile
                tgt_spec,                                      # targets
            ],
            out_specs=pl.BlockSpec((1, 1), lambda i: (0, i)),  # per-tile sums
        ),
        compiler_params=pltpu.CompilerParams(
            dimension_semantics=("parallel",),    # shardable across TCs (v7x)
            vmem_limit_bytes=vmem_limit,
        ),
    )(inputs, targets2d)

    # Final reduction + mean in plain JAX (pairwise, f32).
    return jnp.sum(partials) / jnp.float32(n)


def _reference_focal_loss(inputs, targets):
    # Pure-JAX reference mirroring the PyTorch module (for correctness check).
    logp = jax.nn.log_softmax(inputs.astype(jnp.float32), axis=-1)
    ce = -jnp.take_along_axis(logp, targets[:, None].astype(jnp.int32),
                              axis=-1)[:, 0]
    pt = jnp.exp(-ce)
    return jnp.mean(ALPHA * (1.0 - pt) ** GAMMA * ce)


if __name__ == "__main__":
    key = jax.random.PRNGKey(0)
    k1, k2, k3, k4, k5, k6 = jax.random.split(key, 6)

    # Case 1: small single-tile f32 (original toy shapes: batch=8, classes=32).
    n1, c1 = 8, 32
    x1 = jax.random.normal(k1, (n1, c1), dtype=jnp.float32)
    y1 = jax.random.randint(k2, (n1,), 0, c1, dtype=jnp.int32)
    loss1 = focal_loss(x1, y1)
    jax.block_until_ready(loss1)
    ref1 = _reference_focal_loss(x1, y1)
    assert jnp.allclose(loss1, ref1, rtol=1e-5, atol=1e-6), (loss1, ref1)

    # Case 2: multi-tile "parallel" grid, ragged last tile, resident targets.
    n2, c2 = 20, 128
    x2 = jax.random.normal(k3, (n2, c2), dtype=jnp.float32)
    y2 = jax.random.randint(k4, (n2,), 0, c2, dtype=jnp.int32)
    loss2 = focal_loss(x2, y2, tile_n=8)   # grid = 3 tiles, last tile ragged
    jax.block_until_ready(loss2)
    ref2 = _reference_focal_loss(x2, y2)
    assert jnp.allclose(loss2, ref2, rtol=1e-5, atol=1e-6), (loss2, ref2)

    # Case 2b: same problem through the per-step targets-DMA fallback path.
    loss2b = focal_loss(x2, y2, tile_n=8, resident_targets=False)
    jax.block_until_ready(loss2b)
    assert jnp.allclose(loss2b, ref2, rtol=1e-5, atol=1e-6), (loss2b, ref2)

    # Case 3: bf16 logits -> bf16 element-wise pipeline with f32 reductions.
    n3, c3 = 24, 64
    x3 = jax.random.normal(k5, (n3, c3), dtype=jnp.float32).astype(jnp.bfloat16)
    y3 = jax.random.randint(k6, (n3,), 0, c3, dtype=jnp.int32)
    loss3 = focal_loss(x3, y3, tile_n=16)  # 2 tiles, ragged, bf16-aligned
    jax.block_until_ready(loss3)
    ref3 = _reference_focal_loss(x3.astype(jnp.float32), y3)
    assert jnp.allclose(loss3, ref3, rtol=5e-2, atol=5e-3), (loss3, ref3)

    print("KERNEL_OK")
</pallas_src>

<mosaic_0001>
module attributes {stable_mosaic.version = 11 : i64} {
  func.func @_focal_loss_kernel(%arg0: i32, %arg1: memref<8x32xf32, #tpu.memory_space<vmem>>, %arg2: memref<8x1xi32, #tpu.memory_space<vmem>>, %arg3: memref<1x1xf32, #tpu.memory_space<vmem>>) attributes {dimension_semantics = [#tpu.dimension_semantics<parallel>], iteration_bounds = array<i64: 1>, scalar_prefetch = 0 : i64, scratch_operands = 0 : i64, tpu.core_type = #tpu.core_type<tc>, window_params = [{transform_indices = @transform_0, window_bounds = array<i64: 8, 32>}, {pipeline_mode = #tpu.pipeline_mode<synchronous>, transform_indices = @transform_1, window_bounds = array<i64: 8, 1>}, {transform_indices = @transform_2, window_bounds = array<i64: 1, 1>}]} {
    %c0 = arith.constant 0 : index
    %c0_0 = arith.constant 0 : index
    %0 = vector.load %arg1[%c0, %c0_0] : memref<8x32xf32, #tpu.memory_space<vmem>>, vector<8x32xf32>
    %c8_i32 = arith.constant 8 : i32
    %1 = arith.muli %arg0, %c8_i32 : i32
    %2 = tpu.assume_multiple %1, 8 : i32
    %3 = arith.index_cast %2 : i32 to index
    %c0_1 = arith.constant 0 : index
    %4 = vector.load %arg2[%3, %c0_1] : memref<8x1xi32, #tpu.memory_space<vmem>>, vector<8x1xi32>
    %cst = arith.constant dense<0xFF800000> : vector<8xf32>
    %5 = vector.multi_reduction <maximumf>, %0, %cst [1] : vector<8x32xf32> to vector<8xf32>
    %6 = vector.shape_cast %5 : vector<8xf32> to vector<8x1xf32>
    %7 = vector.broadcast %6 : vector<8x1xf32> to vector<8x32xf32>
    %8 = arith.subf %0, %7 : vector<8x32xf32>
    %9 = math.exp %8 : vector<8x32xf32>
    %cst_2 = arith.constant dense<0.000000e+00> : vector<8xf32>
    %10 = vector.multi_reduction <add>, %9, %cst_2 [1] : vector<8x32xf32> to vector<8xf32>
    %11 = vector.shape_cast %10 : vector<8xf32> to vector<8x1xf32>
    %12 = math.log %11 : vector<8x1xf32>
    %13 = tpu.iota {dimensions = array<i32: 1>} : vector<8x32xi32>
    %14 = vector.broadcast %4 : vector<8x1xi32> to vector<8x32xi32>
    %15 = arith.cmpi eq, %13, %14 : vector<8x32xi32>
    %cst_3 = arith.constant 0.000000e+00 : f32
    %16 = vector.broadcast %cst_3 : f32 to vector<8x32xf32>
    %17 = arith.select %15, %8, %16 : vector<8x32xi1>, vector<8x32xf32>
    %cst_4 = arith.constant dense<0.000000e+00> : vector<8xf32>
    %18 = vector.multi_reduction <add>, %17, %cst_4 [1] : vector<8x32xf32> to vector<8xf32>
    %19 = vector.shape_cast %18 : vector<8xf32> to vector<8x1xf32>
    %20 = arith.subf %12, %19 : vector<8x1xf32>
    %cst_5 = arith.constant 0.000000e+00 : f32
    %21 = vector.broadcast %cst_5 : f32 to vector<8x1xf32>
    %22 = arith.subf %21, %20 : vector<8x1xf32>
    %23 = math.exp %22 : vector<8x1xf32>
    %cst_6 = arith.constant 1.000000e+00 : f32
    %24 = vector.broadcast %cst_6 : f32 to vector<8x1xf32>
    %25 = arith.subf %24, %23 : vector<8x1xf32>
    %cst_7 = arith.constant 1.000000e+00 : f32
    %26 = vector.broadcast %cst_7 : f32 to vector<8x1xf32>
    %27 = arith.mulf %26, %25 : vector<8x1xf32>
    %28 = arith.mulf %27, %25 : vector<8x1xf32>
    %29 = arith.mulf %28, %20 : vector<8x1xf32>
    %30 = vector.shape_cast %29 : vector<8x1xf32> to vector<1x8x1xf32>
    %cst_8 = arith.constant dense<0.000000e+00> : vector<1xf32>
    %31 = vector.multi_reduction <add>, %30, %cst_8 [1, 2] : vector<1x8x1xf32> to vector<1xf32>
    %32 = vector.shape_cast %31 : vector<1xf32> to vector<1x1x1xf32>
    %33 = vector.extract %32[0, 0, 0] : f32 from vector<1x1x1xf32>
    %34 = vector.broadcast %33 : f32 to vector<1x1xf32>
    %c0_9 = arith.constant 0 : index
    %c0_10 = arith.constant 0 : index
    %35 = vector.load %arg3[%c0_9, %c0_10] : memref<1x1xf32, #tpu.memory_space<vmem>>, vector<1x1xf32>
    tpu.vector_store %arg3[%c0_9, %c0_10], %34 {strides = array<i32>} : memref<1x1xf32, #tpu.memory_space<vmem>>, vector<1x1xf32>,
    return
  }
  func.func @transform_0(%arg0: i32) -> (i32, i32) {
    %c0_i32 = arith.constant 0 : i32
    %c0_i32_0 = arith.constant 0 : i32
    return %arg0, %c0_i32 : i32, i32
  }
  func.func @transform_1(%arg0: i32) -> (i32, i32) {
    %c0_i32 = arith.constant 0 : i32
    %c0_i32_0 = arith.constant 0 : i32
    %c0_i32_1 = arith.constant 0 : i32
    return %c0_i32, %c0_i32_0 : i32, i32
  }
  func.func @transform_2(%arg0: i32) -> (i32, i32) {
    %c0_i32 = arith.constant 0 : i32
    %c0_i32_0 = arith.constant 0 : i32
    return %c0_i32, %arg0 : i32, i32
  }
}

</mosaic_0001>

<bundles_post_ra>
// kernel: tpu_custom_call.1
= control target key start
LH: loop header
LB: loop body
LE: loop exit
PB: predicated region body
PF: predicated region fallthrough
CT: control target
= control target key end

     0   :  { %vm16_vm0 = vcmask 261120   ;;  %s135_s0 = inlined_call_operand.vmem [shape: f32[8,32], index: 0, kind: input, shape index: {}]   ;;  %s136_s1 = inlined_call_operand.vmem [shape: s32[8,1], index: 1, kind: input, shape index: {}]   ;;  %s137_s2 = inlined_call_operand.hbm [shape: f32[1,1], index: 2, kind: output, shape index: {}]  }
   0x1   :  { %v12_v0 = vld [vmem:[%s135_s0] sm:$0xff] }
   0x2   :  { %7 = vsyncpa [#allocation3], 0  ;;  %v17_v1 = vsel %vm16_vm0, %v12_v0, -inf  ;;  %v106_v2 = vmov 0   ;;  %v15_v3 = vld [vmem:[%s136_s1] sm:$0xff]  ;;  %v28_v7 = vlaneseq  ;;  %vm45_vm2 = vcmask 7168  }
   0x3   :  { %77 = vset.pattern.permute.xlu0 %v106_v2  ;;  %s107_s0 = smov [#allocation2]   ;;  %vm57_vm3 = vcmask 0  }
   0x4   :  { %18 = vmax.xlane.f32.xlu0 %v17_v1  ;;  %v29_v8 = vand.u32 127, %v28_v7  ;;  %s65_s1 = sshll.u32 %s107_s0, 4  ;;  %s66_s1 = int_to_ptr.vmem [resolvable:$true] %s65_s1 }
   0x5   :  { %s84_s14 = scalar_lea.vmem %s66_s1, 16  ;;  %s88_s15 = scalar_lea.vmem %s66_s1, 32 }
   0x6   :  { %p85_p0 = scmp.ne.s32.totalorder %s66_s1, %s84_s14  ;;  %p89_p1 = scmp.lt.s32.totalorder %s66_s1, %s66_s1 }
   0x7   :  { %p90_p2 = scmp.lt.s32.totalorder %s88_s15, %s84_s14 }
   0x9   :  { %p91_p3 = por %p90_p2, %p89_p1 }
   0xb   :  { %p92_p4 = pnand %p91_p3, %p85_p0 }
  0x1a   :  { %31 = vperm.xlu0 %77, %v15_v3  }
  0x8d   :  { %v19_v4 = vpop.xlane.xlu0 %18 }
  0x8e   :  { %v20_v5 = vsub.f32 %v12_v0, %v19_v4 }
  0x90   :  { %v21_v6 = vmul.f32 1.442695, %v20_v5 }
  0x92   :  { %78 = vpow2.f32 %v21_v6 }
  0x95   :  { %v32_v9 = vpop.permute.xlu0 %31 }
  0x96   :  { %vm33_vm1 = vcmp.eq.s32.totalorder %v29_v8, %v32_v9 }
  0x97   :  { %v34_v12 = vsel %vm33_vm1, %v20_v5, 0.0 }
  0x98   :  { %v35_v13 = vsel %vm16_vm0, %v34_v12, 0.0 }
  0x9f   :  { %v79_v10 = vpop.eup %78 }
  0xa0   :  { %v23_v11 = vsel %vm16_vm0, %v79_v10, 0.0 }
  0xa1   :  { %24 = vadd.xlane.f32.xlu1 %v23_v11 }
  0xa5   :  { %36 = vadd.xlane.f32.xlu1 %v35_v13 }
 0x12a   :  { %v25_v14 = vpop.xlane.xlu1 %24 }
 0x12b   :  { %80 = vlog2.f32 %v25_v14 }
 0x12e   :  { %v37_v17 = vpop.xlane.xlu1 %36 }
 0x138   :  { %v81_v15 = vpop.eup %80 }
 0x139   :  { %v27_v16 = vmul.f32 0.6931472, %v81_v15 }
 0x13b   :  { %v38_v18 = vsub.f32 %v27_v16, %v37_v17 }
 0x13d   :  { %v39_v19 = vsub.f32 0.0, %v38_v18 }
 0x13f   :  { %v40_v20 = vmul.f32 1.442695, %v39_v19 }
 0x141   :  { %82 = vpow2.f32 %v40_v20 }
 0x14e   :  { %v83_v21 = vpop.eup %82 }
 0x14f   :  { %v42_v22 = vsub.f32 1.0, %v83_v21 }
 0x151   :  { %v43_v23 = vmul.f32 %v42_v22, %v42_v22 }
 0x153   :  { %v44_v24 = vmul.f32 %v43_v23, %v38_v18 }
 0x155   :  { %v46_v25 = vsel %vm45_vm2, %v44_v24, 0.0 }
 0x156   :  { %47 = vadd.xlane.f32.xlu1 %v46_v25 }
 0x1df   :  { %v48_v26 = vpop.xlane.xlu1 %47 }
 0x1e0   :  { %v49_v27 = vrot.slane %v48_v26, 4 }
 0x1e2   :  { %v50_v28 = vadd.f32 %v49_v27, %v48_v26 }
 0x1e4   :  { %v51_v29 = vrot.slane %v50_v28, 2 }
 0x1e6   :  { %v52_v30 = vadd.f32 %v51_v29, %v50_v28 }
 0x1e8   :  { %v53_v31 = vrot.slane %v52_v30, 1 }
 0x1ea   :  { %v54_v32 = vadd.f32 %v53_v31, %v52_v30 }
 0x1ec   :  { %73 = vpush %v54_v32 }
 0x21d   :  { %s74_s13 = spop %73 }
 0x21e   :  { %v56_v33 = vstv %s74_s13 }
 0x21f   :  { %58 = vst.msk [vmem:[#allocation2] sm:$0x1] %vm57_vm3, %v56_v33 }
 0x220   :  { %95 = shalt.err (!%p92_p4)
}
 0x221   :  { %68 = dma.vmem_to_hbm [thread:$0]  %s66_s1, 16, %s137_s2, [#allocation3]  }
 0x222   :  { %104 = dma.done.wait [#allocation3], 16  }
 0x223   :  { %105 = vsyncadd [#allocation3], 4294967280 }
 0x224   :  { %72 = vsyncpa [#allocation3], 1 }

</bundles_post_ra>
